<compile_context>
chip_gen: v6e
topology: v6e:2x2x1
jax: 0.10.0
libtpu: 0.0.40
codegen_flags: <defaults>
</compile_context>

<pallas_src>
import jax
import jax.numpy as jnp
from jax.experimental import pallas as pl
from jax.experimental.pallas import tpu as pltpu


def _wefusion_kernel(w_ref, *refs):
    # w_ref:            (L,) f32 softmaxed fusion weights, SMEM (scalar reads)
    # refs[:-1]:        L feature tiles, each (tile_m, 128), VMEM
    # refs[-1]:         fused output tile, (tile_m, 128), VMEM
    *feat_refs, out_ref = refs

    # Stream one feature block at a time: scalar (SMEM) * vector, f32 accumulate.
    acc = feat_refs[0][...].astype(jnp.float32) * w_ref[0]
    for l in range(1, len(feat_refs)):
        acc = acc + feat_refs[l][...].astype(jnp.float32) * w_ref[l]

    out_ref[...] = acc.astype(out_ref.dtype)


def _round_up(x, m):
    return (x + m - 1) // m * m


def wefusion(feature_list, weight, *, target_tile_m=1024):
    """Weighted fusion of a list of equally-shaped feature tensors.

    feature_list: list of arrays, each of identical shape (e.g. NCHW).
    weight:       (feat_len,) raw weights; softmax over feat_len is applied
                  (in the wrapper, O(L) scalar work) to match the PyTorch module.
    """
    L = len(feature_list)
    assert weight.shape == (L,)
    orig_shape = feature_list[0].shape
    dtype = feature_list[0].dtype

    n = 1
    for d in orig_shape:
        n *= int(d)

    lane = 128
    m_total = _round_up(n, lane) // lane

    # Big blocks (memory-bound kernel): tile_m=1024 -> 0.5 MiB per f32 input
    # block; double-buffered (L+1) buffers stay well inside the default scoped
    # VMEM on v5e (16 MiB), v6e (32 MiB) and v7x (32 MiB scoped / 64 MiB phys).
    if m_total <= target_tile_m:
        tile_m = m_total                    # single full-extent block
    else:
        tile_m = target_tile_m              # multiple of 8 sublanes

    m_padded = _round_up(m_total, tile_m)
    n_padded = m_padded * lane

    def prep(x):
        flat = x.reshape(-1)
        if n_padded != n:                   # pad only if truly needed
            flat = jnp.pad(flat, (0, n_padded - n))
        return flat.reshape(m_padded, lane)

    feats = [prep(x) for x in feature_list]

    # Precompute softmax once (matches F.softmax(self.weight, 0)); lives in SMEM.
    w_sm = jax.nn.softmax(weight.astype(jnp.float32), axis=0)   # (L,)

    grid = (m_padded // tile_m,)

    feat_spec = pl.BlockSpec((tile_m, lane), lambda i: (i, 0))
    in_specs = [pl.BlockSpec(memory_space=pltpu.MemorySpace.SMEM)] + [feat_spec] * L

    itemsize = jnp.dtype(dtype).itemsize
    cost = pl.CostEstimate(
        flops=2 * L * n,
        transcendentals=0,
        bytes_accessed=(L + 1) * n * itemsize,
    )

    out = pl.pallas_call(
        _wefusion_kernel,
        out_shape=jax.ShapeDtypeStruct((m_padded, lane), dtype),
        grid_spec=pltpu.PrefetchScalarGridSpec(
            num_scalar_prefetch=0,
            grid=grid,
            in_specs=in_specs,
            out_specs=pl.BlockSpec((tile_m, lane), lambda i: (i, 0)),
        ),
        compiler_params=pltpu.CompilerParams(
            dimension_semantics=("parallel",)),
        cost_estimate=cost,
    )(w_sm, *feats)

    return out.reshape(-1)[:n].reshape(orig_shape)


def wefusion_reference(feature_list, weight):
    sm = jax.nn.softmax(weight.astype(jnp.float32), axis=0)
    acc = jnp.zeros_like(feature_list[0], dtype=jnp.float32)
    for i in range(len(feature_list)):
        acc = acc + feature_list[i].astype(jnp.float32) * sm[i]
    return acc.astype(feature_list[0].dtype)


if __name__ == "__main__":
    key = jax.random.PRNGKey(0)

    # --- main test: NCHW features, same convention as the PyTorch module ---
    feat_len = 4
    B, C, H, W = 2, 4, 16, 16

    keys = jax.random.split(key, feat_len)
    feature_list = [
        jax.random.normal(k, (B, C, H, W), dtype=jnp.float32) for k in keys
    ]
    # nn.Parameter(torch.ones(feat_len)) -> deterministic ones init.
    weight = jnp.ones((feat_len,), dtype=jnp.float32)

    out = wefusion(feature_list, weight)
    out = jax.block_until_ready(out)
    ref = wefusion_reference(feature_list, weight)
    assert out.shape == (B, C, H, W)
    assert jnp.allclose(out, ref, atol=1e-5, rtol=1e-5), "mismatch vs reference"

    # --- small ragged test: exercises the lane-padding path + non-uniform w ---
    keys2 = jax.random.split(jax.random.PRNGKey(1), 3)
    feats2 = [jax.random.normal(k, (2, 3, 5, 7), dtype=jnp.float32) for k in keys2]
    w2 = jnp.array([0.3, -1.2, 2.0], dtype=jnp.float32)
    out2 = jax.block_until_ready(wefusion(feats2, w2))
    ref2 = wefusion_reference(feats2, w2)
    assert jnp.allclose(out2, ref2, atol=1e-5, rtol=1e-5), "mismatch (padded case)"

    print("KERNEL_OK")
</pallas_src>

<mosaic_0001>
module attributes {stable_mosaic.version = 11 : i64} {
  func.func @_wefusion_kernel(%arg0: i32, %arg1: memref<4xf32, #tpu.memory_space<smem>>, %arg2: memref<16x128xf32, #tpu.memory_space<vmem>>, %arg3: memref<16x128xf32, #tpu.memory_space<vmem>>, %arg4: memref<16x128xf32, #tpu.memory_space<vmem>>, %arg5: memref<16x128xf32, #tpu.memory_space<vmem>>, %arg6: memref<16x128xf32, #tpu.memory_space<vmem>>) attributes {dimension_semantics = [#tpu.dimension_semantics<parallel>], iteration_bounds = array<i64: 1>, scalar_prefetch = 0 : i64, scratch_operands = 0 : i64, tpu.core_type = #tpu.core_type<tc>, window_params = [{transform_indices = @transform_0, window_bounds = array<i64: 4>}, {transform_indices = @transform_1, window_bounds = array<i64: 16, 128>}, {transform_indices = @transform_2, window_bounds = array<i64: 16, 128>}, {transform_indices = @transform_3, window_bounds = array<i64: 16, 128>}, {transform_indices = @transform_4, window_bounds = array<i64: 16, 128>}, {transform_indices = @transform_5, window_bounds = array<i64: 16, 128>}]} {
    %c0 = arith.constant 0 : index
    %c0_0 = arith.constant 0 : index
    %0 = vector.load %arg2[%c0, %c0_0] : memref<16x128xf32, #tpu.memory_space<vmem>>, vector<16x128xf32>
    %c0_1 = arith.constant 0 : index
    %1 = memref.load %arg1[%c0_1] : memref<4xf32, #tpu.memory_space<smem>>
    %2 = vector.broadcast %1 : f32 to vector<16x128xf32>
    %3 = arith.mulf %0, %2 : vector<16x128xf32>
    %c0_2 = arith.constant 0 : index
    %c0_3 = arith.constant 0 : index
    %4 = vector.load %arg3[%c0_2, %c0_3] : memref<16x128xf32, #tpu.memory_space<vmem>>, vector<16x128xf32>
    %c1 = arith.constant 1 : index
    %5 = memref.load %arg1[%c1] : memref<4xf32, #tpu.memory_space<smem>>
    %6 = vector.broadcast %5 : f32 to vector<16x128xf32>
    %7 = arith.mulf %4, %6 : vector<16x128xf32>
    %8 = arith.addf %3, %7 : vector<16x128xf32>
    %c0_4 = arith.constant 0 : index
    %c0_5 = arith.constant 0 : index
    %9 = vector.load %arg4[%c0_4, %c0_5] : memref<16x128xf32, #tpu.memory_space<vmem>>, vector<16x128xf32>
    %c2 = arith.constant 2 : index
    %10 = memref.load %arg1[%c2] : memref<4xf32, #tpu.memory_space<smem>>
    %11 = vector.broadcast %10 : f32 to vector<16x128xf32>
    %12 = arith.mulf %9, %11 : vector<16x128xf32>
    %13 = arith.addf %8, %12 : vector<16x128xf32>
    %c0_6 = arith.constant 0 : index
    %c0_7 = arith.constant 0 : index
    %14 = vector.load %arg5[%c0_6, %c0_7] : memref<16x128xf32, #tpu.memory_space<vmem>>, vector<16x128xf32>
    %c3 = arith.constant 3 : index
    %15 = memref.load %arg1[%c3] : memref<4xf32, #tpu.memory_space<smem>>
    %16 = vector.broadcast %15 : f32 to vector<16x128xf32>
    %17 = arith.mulf %14, %16 : vector<16x128xf32>
    %18 = arith.addf %13, %17 : vector<16x128xf32>
    %c0_8 = arith.constant 0 : index
    %c0_9 = arith.constant 0 : index
    %19 = vector.load %arg6[%c0_8, %c0_9] : memref<16x128xf32, #tpu.memory_space<vmem>>, vector<16x128xf32>
    tpu.vector_store %arg6[%c0_8, %c0_9], %18 {strides = array<i32>} : memref<16x128xf32, #tpu.memory_space<vmem>>, vector<16x128xf32>,
    return
  }
  func.func @transform_0(%arg0: i32) -> i32 {
    %c0_i32 = arith.constant 0 : i32
    %c0_i32_0 = arith.constant 0 : i32
    return %c0_i32 : i32
  }
  func.func @transform_1(%arg0: i32) -> (i32, i32) {
    %c0_i32 = arith.constant 0 : i32
    %c0_i32_0 = arith.constant 0 : i32
    return %arg0, %c0_i32 : i32, i32
  }
  func.func @transform_2(%arg0: i32) -> (i32, i32) {
    %c0_i32 = arith.constant 0 : i32
    %c0_i32_0 = arith.constant 0 : i32
    return %arg0, %c0_i32 : i32, i32
  }
  func.func @transform_3(%arg0: i32) -> (i32, i32) {
    %c0_i32 = arith.constant 0 : i32
    %c0_i32_0 = arith.constant 0 : i32
    return %arg0, %c0_i32 : i32, i32
  }
  func.func @transform_4(%arg0: i32) -> (i32, i32) {
    %c0_i32 = arith.constant 0 : i32
    %c0_i32_0 = arith.constant 0 : i32
    return %arg0, %c0_i32 : i32, i32
  }
  func.func @transform_5(%arg0: i32) -> (i32, i32) {
    %c0_i32 = arith.constant 0 : i32
    %c0_i32_0 = arith.constant 0 : i32
    return %arg0, %c0_i32 : i32, i32
  }
}

</mosaic_0001>

<bundles_post_ra>
// kernel: tpu_custom_call.1
= control target key start
LH: loop header
LB: loop body
LE: loop exit
PB: predicated region body
PF: predicated region fallthrough
CT: control target
= control target key end

     0   :  { %10 = vsyncpa [#allocation5], 0  ;;  %s339_s0 = inlined_call_operand.hbm [shape: f32[4], index: 0, kind: input, shape index: {}]   ;;  %s340_s1 = inlined_call_operand.hbm [shape: f32[16,128], index: 1, kind: input, shape index: {}]   ;;  %s341_s2 = inlined_call_operand.hbm [shape: f32[16,128], index: 2, kind: input, shape index: {}]   ;;  %s342_s3 = inlined_call_operand.hbm [shape: f32[16,128], index: 3, kind: input, shape index: {}]   ;;  %s343_s4 = inlined_call_operand.hbm [shape: f32[16,128], index: 4, kind: input, shape index: {}]   ;;  %s344_s5 = inlined_call_operand.hbm [shape: f32[16,128], index: 5, kind: output, shape index: {}]  }
   0x1   :  { %11 = vsyncpa [#allocation3], 0 }
   0x2   :  { %12 = vsyncpa [#allocation8], 0 }
   0x3   :  { %13 = vsyncpa [#allocation11], 0 }
   0x4   :  { %14 = vsyncpa [#allocation4], 0  ;;  %s268_s18 = smov [#allocation7]   ;;  %s269_s20 = smov [#allocation6]  }
   0x5   :  { %s40_s19 = sshll.u32 %s268_s18, 4  ;;  %s28_s21 = sshll.u32 %s269_s20, 4  ;;  %s41_s19 = int_to_ptr.vmem [resolvable:$true] %s40_s19  ;;  %s29_s21 = int_to_ptr.vmem [resolvable:$true] %s28_s21 }
   0x6   :  { %s158_s22 = scalar_lea.vmem %s41_s19, 256  ;;  %p163_p1 = scmp.lt.s32.totalorder %s41_s19, %s41_s19 }
   0x7   :  { %p159_p0 = scmp.ne.s32.totalorder %s41_s19, %s158_s22  ;;  %p164_p2 = scmp.lt.s32.totalorder %s158_s22, %s158_s22 }
   0x9   :  { %p165_p3 = por %p164_p2, %p163_p1 }
   0xb   :  { %p166_p4 = pnand %p165_p3, %p159_p0 }
   0xd   :  { %169 = shalt.err (!%p166_p4)
}
   0xe   :  { %s270_s23 = smov 128   ;;  %s271_s24 = smov 8  }
   0xf   :  { %46 = dma.hbm_to_vmem [thread:$0]  %s341_s2, 256, %s41_s19, [#allocation8], %s270_s23, %s270_s23, %s271_s24  }
  0x10   :  { %s272_s27 = smov [#allocation2]   ;;  %s186_s30 = scalar_lea.vmem %s29_s21, 256 }
  0x11   :  { %22 = dma.hbm_to_smem %s339_s0, 16, %s272_s27, [#allocation5]  }
  0x12   :  { %p187_p5 = scmp.ne.s32.totalorder %s29_s21, %s186_s30  ;;  %p191_p6 = scmp.lt.s32.totalorder %s29_s21, %s29_s21 }
  0x13   :  { %p192_p7 = scmp.lt.s32.totalorder %s186_s30, %s186_s30 }
  0x15   :  { %p193_p8 = por %p192_p7, %p191_p6 }
  0x17   :  { %p194_p9 = pnand %p193_p8, %p187_p5 }
  0x19   :  { %197 = shalt.err (!%p194_p9)
}
  0x1a   :  { %34 = dma.hbm_to_vmem [thread:$0]  %s340_s1, 256, %s29_s21, [#allocation3], %s270_s23, %s270_s23, %s271_s24  }
  0x1b   :  { %s273_s2 = smov [#allocation9]   ;;  %s274_s9 = smov [#allocation10]  }
  0x1c   :  { %s52_s8 = sshll.u32 %s273_s2, 4  ;;  %s64_s0 = sshll.u32 %s274_s9, 4  ;;  %s53_s8 = int_to_ptr.vmem [resolvable:$true] %s52_s8  ;;  %s65_s0 = int_to_ptr.vmem [resolvable:$true] %s64_s0 }
  0x1d   :  { %s206_s10 = scalar_lea.vmem %s53_s8, 256  ;;  %p211_p11 = scmp.lt.s32.totalorder %s53_s8, %s53_s8 }
  0x1e   :  { %p207_p10 = scmp.ne.s32.totalorder %s53_s8, %s206_s10  ;;  %p212_p12 = scmp.lt.s32.totalorder %s206_s10, %s206_s10 }
  0x20   :  { %p213_p13 = por %p212_p12, %p211_p11 }
  0x22   :  { %p214_p0 = pnand %p213_p13, %p207_p10 }
  0x24   :  { %217 = shalt.err (!%p214_p0)
}
  0x25   :  { %58 = dma.hbm_to_vmem [thread:$0]  %s342_s3, 256, %s53_s8, [#allocation8], %s270_s23, %s270_s23, %s271_s24  }
  0x26   :  { %s226_s1 = scalar_lea.vmem %s65_s0, 256  ;;  %p231_p2 = scmp.lt.s32.totalorder %s65_s0, %s65_s0 }
  0x27   :  { %p227_p1 = scmp.ne.s32.totalorder %s65_s0, %s226_s1  ;;  %p232_p3 = scmp.lt.s32.totalorder %s226_s1, %s226_s1 }
  0x29   :  { %p233_p4 = por %p232_p3, %p231_p2 }
  0x2b   :  { %p234_p5 = pnand %p233_p4, %p227_p1 }
  0x2d   :  { %237 = shalt.err (!%p234_p5)
}
  0x2e   :  { %70 = dma.hbm_to_vmem [thread:$0]  %s343_s4, 256, %s65_s0, [#allocation11], %s270_s23, %s270_s23, %s271_s24  }
  0x2f   :  { %258 = dma.done.wait [#allocation5], 16  }
  0x30   :  { %259 = vsyncadd [#allocation5], 4294967280 }
  0x31   :  { %260 = dma.done.wait [#allocation3], 256  }
  0x32   :  { %261 = vsyncadd [#allocation3], 4294967040 }
  0x33   :  { %262 = dma.done.wait [#allocation8], 512  }
  0x34   :  { %263 = vsyncadd [#allocation8], 4294966784 }
  0x35   :  { %264 = dma.done.wait [#allocation11], 256  }
  0x36   :  { %265 = vsyncadd [#allocation11], 4294967040 }
  0x37   :  { %86 = sfence }
  0x38   :  { %s89_s3 = sld [smem:[#allocation2]]  ;;  %v87_v0 = vld [vmem:[#allocation6] sm:$0xff]  ;;  %v88_v1 = vld [vmem:[#allocation6 + $0x8] sm:$0xff]  ;;  %v93_v2 = vld [vmem:[#allocation7] sm:$0xff]  ;;  %s275_s4 = smov [#allocation12]  }
  0x39   :  { %s139_s15 = sld [smem:[#allocation2 + $0x1]]  ;;  %v94_v3 = vld [vmem:[#allocation7 + $0x8] sm:$0xff]  ;;  %v101_v5 = vld [vmem:[#allocation9] sm:$0xff]  ;;  %v102_v6 = vld [vmem:[#allocation9 + $0x8] sm:$0xff]  ;;  %s124_s18 = sshll.u32 %s275_s4, 4  ;;  %s125_s18 = int_to_ptr.vmem [resolvable:$true] %s124_s18 }
  0x3a   :  { %s140_s16 = sld [smem:[#allocation2 + $0x2]]  ;;  %v109_v9 = vld [vmem:[#allocation10] sm:$0xff]  ;;  %v110_v11 = vld [vmem:[#allocation10 + $0x8] sm:$0xff]  ;;  %s238_s19 = scalar_lea.vmem %s125_s18, 256 }
  0x3b   :  { %s141_s17 = sld [smem:[#allocation2 + $0x3]]  ;;  %p239_p6 = scmp.ne.s32.totalorder %s125_s18, %s238_s19 }
  0x3c   :  { %p243_p7 = scmp.lt.s32.totalorder %s125_s18, %s125_s18  ;;  %p244_p8 = scmp.lt.s32.totalorder %s238_s19, %s238_s19 }
  0x3e   :  { %v90_v4 = vstv %s89_s3  ;;  %p245_p9 = por %p244_p8, %p243_p7 }
  0x3f   :  { %v91_v7 = vmul.f32 %v90_v4, %v87_v0  ;;  %v96_v8 = vstv %s139_s15  ;;  %v92_v10 = vmul.f32 %v90_v4, %v88_v1 }
  0x40   :  { %v97_v12 = vmul.f32 %v96_v8, %v93_v2  ;;  %v104_v13 = vstv %s140_s16  ;;  %v98_v14 = vmul.f32 %v96_v8, %v94_v3  ;;  %p246_p10 = pnand %p245_p9, %p239_p6 }
  0x41   :  { %v105_v15 = vmul.f32 %v104_v13, %v101_v5  ;;  %v112_v16 = vstv %s141_s17  ;;  %v106_v17 = vmul.f32 %v104_v13, %v102_v6 }
  0x42   :  { %v99_v18 = vadd.f32 %v97_v12, %v91_v7  ;;  %v113_v19 = vmul.f32 %v112_v16, %v109_v9  ;;  %v100_v20 = vadd.f32 %v98_v14, %v92_v10  ;;  %v114_v21 = vmul.f32 %v112_v16, %v110_v11 }
  0x44   :  { %v107_v22 = vadd.f32 %v105_v15, %v99_v18  ;;  %v108_v23 = vadd.f32 %v106_v17, %v100_v20 }
  0x46   :  { %v115_v24 = vadd.f32 %v113_v19, %v107_v22  ;;  %v116_v25 = vadd.f32 %v114_v21, %v108_v23 }
  0x48   :  { %117 = vst [vmem:[#allocation12] sm:$0xff] %v115_v24  ;;  %118 = vst [vmem:[#allocation12 + $0x8] sm:$0xff] %v116_v25 }
  0x49   :  { %249 = shalt.err (!%p246_p10)
}
  0x4a   :  { %130 = dma.vmem_to_hbm [thread:$0]  %s125_s18, 256, %s344_s5, [#allocation4], %s270_s23, %s270_s23, %s271_s24  }
  0x4b   :  { %266 = dma.done.wait [#allocation4], 256  }
  0x4c   :  { %267 = vsyncadd [#allocation4], 4294967040 }
  0x4d   :  { %134 = vsyncpa [#allocation3], 1 }
  0x4e   :  { %135 = vsyncpa [#allocation8], 1 }
  0x4f   :  { %136 = vsyncpa [#allocation11], 1 }
  0x50   :  { %137 = vsyncpa [#allocation4], 1 }
  0x51   :  { %138 = vsyncpa [#allocation5], 1 }

</bundles_post_ra>
